<compile_context>
chip_gen: v7x
topology: tpu7x:2x2x1
jax: 0.10.0
libtpu: 0.0.40
codegen_flags: <defaults>
</compile_context>

<pallas_src>
import jax
import jax.numpy as jnp
from jax.experimental import pallas as pl
from jax.experimental.pallas import tpu as pltpu


# ----------------------------- Pallas kernel -----------------------------

def _repvit_mlp_kernel(x_ref, w1_ref, b1_ref, w2_ref, b2_ref, o_ref):
    """Fused RepVitMlp tile in native channels-first layout.

    x_ref  : (Cin, thw)      activation tile (thw = spatial positions on lanes)
    w1_ref : (hidden, Cin)   conv1 weight, BN scale folded in, bf16
    b1_ref : (hidden, 1)     conv1 folded BN bias, f32
    w2_ref : (Cout, hidden)  conv2 weight, BN scale folded in, bf16
    b2_ref : (Cout, 1)       conv2 folded BN bias, f32
    o_ref  : (Cout, thw)
    """
    x = x_ref[...].astype(jnp.bfloat16)                      # cheap VPU cast; bf16 MXU

    # conv1 (1x1) + folded BN bias
    h = jnp.dot(w1_ref[...], x, preferred_element_type=jnp.float32)
    h = h + b1_ref[...]

    # GELU (tanh approximation).  tanh -> EUP slot; polynomial kept to 3 VPU muls.
    c = jnp.float32(0.7978845608028654)                       # sqrt(2/pi)
    inner = c * h * (1.0 + 0.044715 * (h * h))
    h = 0.5 * h * (1.0 + jnp.tanh(inner))

    # conv2 (1x1) + folded BN bias — intermediate never leaves VMEM/vregs.
    y = jnp.dot(w2_ref[...], h.astype(jnp.bfloat16),
                preferred_element_type=jnp.float32)
    y = y + b2_ref[...]

    o_ref[...] = y.astype(o_ref.dtype)


# ----------------------------- wrapper -----------------------------

def _choose_thw(HW, N, thw, min_steps=8):
    """Pick the spatial (lane) tile: as big as requested, but keep >= min_steps grid
    steps when the problem allows so the pipeline overlaps and megacore shards."""
    if HW <= thw:
        return HW                                  # one full-width block (always legal)
    thw = max(128, (thw // 128) * 128)             # tiled blocks must be lane-aligned
    while thw > 128 and N * pl.cdiv(HW, thw) < min_steps:
        thw //= 2
    return thw


def repvit_mlp(x_nchw, kparams, *, thw=512):
    """RepVitMlp forward.  x_nchw: (N, C, H, W), exactly like the PyTorch module."""
    N, Cin, H, W = x_nchw.shape
    hidden = kparams["w1"].shape[0]
    Cout = kparams["w2"].shape[0]
    HW = H * W

    x3 = x_nchw.reshape(N, Cin, HW)                # free reshape — stays channels-first
    thw = _choose_thw(HW, N, thw)
    grid = (N, pl.cdiv(HW, thw))                   # ragged tail handled by Pallas masking

    out = pl.pallas_call(
        _repvit_mlp_kernel,
        out_shape=jax.ShapeDtypeStruct((N, Cout, HW), x_nchw.dtype),
        grid=grid,
        in_specs=[
            pl.BlockSpec((None, Cin, thw), lambda n, t: (n, 0, t)),
            pl.BlockSpec((hidden, Cin), lambda n, t: (0, 0)),     # VMEM-resident weights
            pl.BlockSpec((hidden, 1), lambda n, t: (0, 0)),
            pl.BlockSpec((Cout, hidden), lambda n, t: (0, 0)),
            pl.BlockSpec((Cout, 1), lambda n, t: (0, 0)),
        ],
        out_specs=pl.BlockSpec((None, Cout, thw), lambda n, t: (n, 0, t)),
        compiler_params=pltpu.CompilerParams(
            dimension_semantics=("parallel", "parallel"),
        ),
    )(x3, kparams["w1"], kparams["b1"], kparams["w2"], kparams["b2"])

    return out.reshape(N, Cout, H, W)


# ----------------------------- parameters -----------------------------

def _fold_bn(conv_w, gamma, beta, mean, var, eps=1e-5):
    """Fold inference-mode BatchNorm into the preceding 1x1 conv: w' = w*s, b' = beta - mean*s."""
    s = gamma / jnp.sqrt(var + eps)
    return conv_w * s[:, None], beta - mean * s


def init_repvit_mlp(key, in_dim, hidden_dim):
    """BN-folded f32 parameters (conv weights in PyTorch (out, in) layout)."""
    k = jax.random.split(key, 10)
    w1 = 0.1 * jax.random.normal(k[0], (hidden_dim, in_dim), jnp.float32)
    g1 = 1.0 + 0.1 * jax.random.normal(k[1], (hidden_dim,), jnp.float32)   # bn_weight_init=1
    be1 = 0.1 * jax.random.normal(k[2], (hidden_dim,), jnp.float32)
    m1 = 0.1 * jax.random.normal(k[3], (hidden_dim,), jnp.float32)
    v1 = 1.0 + 0.1 * jax.random.uniform(k[4], (hidden_dim,), jnp.float32)

    w2 = 0.1 * jax.random.normal(k[5], (in_dim, hidden_dim), jnp.float32)
    g2 = 0.1 * jax.random.normal(k[6], (in_dim,), jnp.float32)             # bn_weight_init=0
    be2 = 0.1 * jax.random.normal(k[7], (in_dim,), jnp.float32)
    m2 = 0.1 * jax.random.normal(k[8], (in_dim,), jnp.float32)
    v2 = 1.0 + 0.1 * jax.random.uniform(k[9], (in_dim,), jnp.float32)

    w1f, b1 = _fold_bn(w1, g1, be1, m1, v1)
    w2f, b2 = _fold_bn(w2, g2, be2, m2, v2)
    return dict(w1=w1f, b1=b1, w2=w2f, b2=b2)


def prepare_kernel_params(p):
    """One-time prep for the kernel: bf16 MXU weights, (C, 1)-shaped f32 biases."""
    return dict(
        w1=p["w1"].astype(jnp.bfloat16),
        b1=p["b1"].reshape(-1, 1),
        w2=p["w2"].astype(jnp.bfloat16),
        b2=p["b2"].reshape(-1, 1),
    )


# ----------------------------- pure-JAX reference -----------------------------

def repvit_mlp_ref(x_nchw, params):
    N, C, H, W = x_nchw.shape
    x = x_nchw.reshape(N, C, H * W).astype(jnp.float32)
    h = jnp.einsum("oc,ncm->nom", params["w1"], x) + params["b1"][None, :, None]
    c = jnp.float32(0.7978845608028654)
    h = 0.5 * h * (1.0 + jnp.tanh(c * h * (1.0 + 0.044715 * (h * h))))
    y = jnp.einsum("oc,ncm->nom", params["w2"], h) + params["b2"][None, :, None]
    return y.reshape(N, -1, H, W).astype(x_nchw.dtype)


# ----------------------------- main -----------------------------

if __name__ == "__main__":
    # Small but lane-dense demo: HW = 32*32 = 1024 spatial positions on lanes,
    # channels on sublanes.  thw clamps to 256 -> grid (2, 4) = 8 pipelined steps.
    N, C, H, W = 2, 64, 32, 32
    hidden = 2 * C          # RepViT uses mlp_ratio = 2

    key = jax.random.PRNGKey(0)
    kx, kp = jax.random.split(key)
    x = jax.random.normal(kx, (N, C, H, W), jnp.float32)     # NCHW, like PyTorch
    params = init_repvit_mlp(kp, C, hidden)
    kparams = prepare_kernel_params(params)

    fn = jax.jit(repvit_mlp)
    out = fn(x, kparams)
    jax.block_until_ready(out)

    assert out.shape == (N, C, H, W), out.shape
    assert bool(jnp.all(jnp.isfinite(out)))

    ref = repvit_mlp_ref(x, params)
    max_err = float(jnp.max(jnp.abs(out - ref)))
    assert max_err < 2e-2, f"max abs error vs reference: {max_err}"

    print("KERNEL_OK")
</pallas_src>

<mosaic_0001>
module attributes {stable_mosaic.version = 11 : i64} {
  func.func @_repvit_mlp_kernel(%arg0: i32, %arg1: i32, %arg2: memref<1x64x256xf32, #tpu.memory_space<vmem>>, %arg3: memref<128x64xbf16, #tpu.memory_space<vmem>>, %arg4: memref<128x1xf32, #tpu.memory_space<vmem>>, %arg5: memref<64x128xbf16, #tpu.memory_space<vmem>>, %arg6: memref<64x1xf32, #tpu.memory_space<vmem>>, %arg7: memref<1x64x256xf32, #tpu.memory_space<vmem>>) attributes {dimension_semantics = [#tpu.dimension_semantics<parallel>, #tpu.dimension_semantics<parallel>], iteration_bounds = array<i64: 2, 4>, scalar_prefetch = 0 : i64, scratch_operands = 0 : i64, tpu.core_type = #tpu.core_type<tc>, window_params = [{transform_indices = @transform_0, window_bounds = array<i64: 1, 64, 256>}, {pipeline_mode = #tpu.pipeline_mode<synchronous>, transform_indices = @transform_1, window_bounds = array<i64: 128, 64>}, {pipeline_mode = #tpu.pipeline_mode<synchronous>, transform_indices = @transform_2, window_bounds = array<i64: 128, 1>}, {pipeline_mode = #tpu.pipeline_mode<synchronous>, transform_indices = @transform_3, window_bounds = array<i64: 64, 128>}, {pipeline_mode = #tpu.pipeline_mode<synchronous>, transform_indices = @transform_4, window_bounds = array<i64: 64, 1>}, {transform_indices = @transform_5, window_bounds = array<i64: 1, 64, 256>}]} {
    %c0 = arith.constant 0 : index
    %c0_0 = arith.constant 0 : index
    %c0_1 = arith.constant 0 : index
    %0 = vector.load %arg2[%c0, %c0_0, %c0_1] : memref<1x64x256xf32, #tpu.memory_space<vmem>>, vector<1x64x256xf32>
    %1 = vector.shape_cast %0 : vector<1x64x256xf32> to vector<64x256xf32>
    %2 = arith.truncf %1 : vector<64x256xf32> to vector<64x256xbf16>
    %c0_2 = arith.constant 0 : index
    %c0_3 = arith.constant 0 : index
    %3 = vector.load %arg3[%c0_2, %c0_3] : memref<128x64xbf16, #tpu.memory_space<vmem>>, vector<128x64xbf16>
    %cst = arith.constant dense<0.000000e+00> : vector<128x256xf32>
    %4 = tpu.matmul %3, %2, %cst {dimension_numbers = #tpu.dot_dimension_numbers<[1], [0], [0], [1], [0, 0, 1, 1], [], []>} : vector<128x64xbf16>, vector<64x256xbf16>, vector<128x256xf32> -> vector<128x256xf32>
    %c0_4 = arith.constant 0 : index
    %c0_5 = arith.constant 0 : index
    %5 = vector.load %arg4[%c0_4, %c0_5] : memref<128x1xf32, #tpu.memory_space<vmem>>, vector<128x1xf32>
    %6 = vector.broadcast %5 : vector<128x1xf32> to vector<128x256xf32>
    %7 = arith.addf %4, %6 : vector<128x256xf32>
    %cst_6 = arith.constant 0.797884583 : f32
    %8 = vector.broadcast %cst_6 : f32 to vector<128x256xf32>
    %9 = arith.mulf %8, %7 : vector<128x256xf32>
    %10 = arith.mulf %7, %7 : vector<128x256xf32>
    %cst_7 = arith.constant 4.471500e-02 : f32
    %11 = vector.broadcast %cst_7 : f32 to vector<128x256xf32>
    %12 = arith.mulf %11, %10 : vector<128x256xf32>
    %cst_8 = arith.constant 1.000000e+00 : f32
    %13 = vector.broadcast %cst_8 : f32 to vector<128x256xf32>
    %14 = arith.addf %13, %12 : vector<128x256xf32>
    %15 = arith.mulf %9, %14 : vector<128x256xf32>
    %cst_9 = arith.constant 5.000000e-01 : f32
    %16 = vector.broadcast %cst_9 : f32 to vector<128x256xf32>
    %17 = arith.mulf %16, %7 : vector<128x256xf32>
    %18 = math.tanh %15 : vector<128x256xf32>
    %cst_10 = arith.constant 1.000000e+00 : f32
    %19 = vector.broadcast %cst_10 : f32 to vector<128x256xf32>
    %20 = arith.addf %19, %18 : vector<128x256xf32>
    %21 = arith.mulf %17, %20 : vector<128x256xf32>
    %c0_11 = arith.constant 0 : index
    %c0_12 = arith.constant 0 : index
    %22 = vector.load %arg5[%c0_11, %c0_12] : memref<64x128xbf16, #tpu.memory_space<vmem>>, vector<64x128xbf16>
    %23 = arith.truncf %21 : vector<128x256xf32> to vector<128x256xbf16>
    %cst_13 = arith.constant dense<0.000000e+00> : vector<64x256xf32>
    %24 = tpu.matmul %22, %23, %cst_13 {dimension_numbers = #tpu.dot_dimension_numbers<[1], [0], [0], [1], [0, 0, 1, 1], [], []>} : vector<64x128xbf16>, vector<128x256xbf16>, vector<64x256xf32> -> vector<64x256xf32>
    %c0_14 = arith.constant 0 : index
    %c0_15 = arith.constant 0 : index
    %25 = vector.load %arg6[%c0_14, %c0_15] : memref<64x1xf32, #tpu.memory_space<vmem>>, vector<64x1xf32>
    %26 = vector.broadcast %25 : vector<64x1xf32> to vector<64x256xf32>
    %27 = arith.addf %24, %26 : vector<64x256xf32>
    %c0_16 = arith.constant 0 : index
    %c0_17 = arith.constant 0 : index
    %c0_18 = arith.constant 0 : index
    %28 = vector.load %arg7[%c0_16, %c0_17, %c0_18] : memref<1x64x256xf32, #tpu.memory_space<vmem>>, vector<1x64x256xf32>
    %29 = vector.shape_cast %28 : vector<1x64x256xf32> to vector<64x256xf32>
    %30 = vector.shape_cast %27 : vector<64x256xf32> to vector<1x64x256xf32>
    tpu.vector_store %arg7[%c0_16, %c0_17, %c0_18], %30 {strides = array<i32>} : memref<1x64x256xf32, #tpu.memory_space<vmem>>, vector<1x64x256xf32>,
    return
  }
  func.func @transform_0(%arg0: i32, %arg1: i32) -> (i32, i32, i32) {
    %c0_i32 = arith.constant 0 : i32
    %c0_i32_0 = arith.constant 0 : i32
    return %arg0, %c0_i32, %arg1 : i32, i32, i32
  }
  func.func @transform_1(%arg0: i32, %arg1: i32) -> (i32, i32) {
    %c0_i32 = arith.constant 0 : i32
    %c0_i32_0 = arith.constant 0 : i32
    %c0_i32_1 = arith.constant 0 : i32
    return %c0_i32, %c0_i32_0 : i32, i32
  }
  func.func @transform_2(%arg0: i32, %arg1: i32) -> (i32, i32) {
    %c0_i32 = arith.constant 0 : i32
    %c0_i32_0 = arith.constant 0 : i32
    %c0_i32_1 = arith.constant 0 : i32
    return %c0_i32, %c0_i32_0 : i32, i32
  }
  func.func @transform_3(%arg0: i32, %arg1: i32) -> (i32, i32) {
    %c0_i32 = arith.constant 0 : i32
    %c0_i32_0 = arith.constant 0 : i32
    %c0_i32_1 = arith.constant 0 : i32
    return %c0_i32, %c0_i32_0 : i32, i32
  }
  func.func @transform_4(%arg0: i32, %arg1: i32) -> (i32, i32) {
    %c0_i32 = arith.constant 0 : i32
    %c0_i32_0 = arith.constant 0 : i32
    %c0_i32_1 = arith.constant 0 : i32
    return %c0_i32, %c0_i32_0 : i32, i32
  }
  func.func @transform_5(%arg0: i32, %arg1: i32) -> (i32, i32, i32) {
    %c0_i32 = arith.constant 0 : i32
    %c0_i32_0 = arith.constant 0 : i32
    return %arg0, %c0_i32, %arg1 : i32, i32, i32
  }
}

</mosaic_0001>

<bundles_post_ra>
// kernel: repvit_mlp.1
= control target key start
LH: loop header
LB: loop body
LE: loop exit
PB: predicated region body
PF: predicated region fallthrough
CT: control target
= control target key end

     0   :  { %s1469_s18 = smov 0   ;;  %s1471_s19 = smov 0   ;;  %s1916_s0 = inlined_call_operand.vmem [shape: f32[2,64,1024], index: 0, kind: input, shape index: {}]   ;;  %s1917_s1 = inlined_call_operand.vmem [shape: bf16[128,64], index: 1, kind: input, shape index: {}]   ;;  %s1918_s2 = inlined_call_operand.vmem [shape: f32[128,1], index: 2, kind: input, shape index: {}]   ;;  %s1919_s3 = inlined_call_operand.vmem [shape: bf16[64,128], index: 3, kind: input, shape index: {}]   ;;  %s1920_s4 = inlined_call_operand.vmem [shape: f32[64,1], index: 4, kind: input, shape index: {}]   ;;  %s1921_s5 = inlined_call_operand.vmem [shape: f32[2,64,1024], index: 5, kind: output, shape index: {}]  }
   0x1   :  { %s1473_s20 = smov 0   ;;  %s1475_s21 = smov 0  }
   0x2   :  { %s1477_s22 = smov 0   ;;  %s1479_s23 = smov 0  }
   0x3   :  { %s1481_s24 = smov 0  }
   0x4 LB: > { %s24_s25 = sadd.s32 1, %s1428_s22  ;;  %s27_s26 = sadd.s32 1, %s1432_s23  ;;  %s1436_s24 = sphi %s1481_s24, %s15_s24   ;;  %s1432_s23 = sphi %s1479_s23, %s1928_s23   ;;  %s1428_s22 = sphi %s1477_s22, %s1927_s22   ;;  %s1424_s21 = sphi %s1475_s21, %s1926_s21   ;;  %s1420_s20 = sphi %s1473_s20, %s1925_s20   ;;  %s1416_s19 = sphi %s1471_s19, %s1924_s19   ;;  %s1412_s18 = sphi %s1469_s18, %s1923_s18  }
   0x5   : > { %p25_p0 = scmp.ge.s32.totalorder %s24_s25, 4  ;;  %s1210_s27 = sadd.s32 4294967295, %s1436_s24  }
   0x6   : > { %p43_p1 = scmp.ne.s32.totalorder %s1416_s19, %s1412_s18  ;;  %p44_p2 = scmp.eq.s32.totalorder %s1436_s24, 0 }
   0x7   : > { %s1930_s25 = smov (%p25_p0, %s24_s25), 0  ;;  %s1932_s26 = smov (!%p25_p0, %s27_s26), %s1432_s23 }
   0x8   : > { %p29_p3 = scmp.ge.s32.totalorder %s1932_s26, 2  ;;  %p159_p4 = scmp.eq.s32.totalorder %s1210_s27, 7 }
   0x9   : > { %s32_s28 = ssub.s32 %s1428_s22, %s1930_s25  ;;  %p45_p5 = por %p44_p2, %p43_p1 }
   0xa   : > { %s1934_s26 = smov (%p29_p3, %s1932_s26), 0  ;;  %p1517_p6 = por %p159_p4, %p43_p1 }
   0xb   : > { %s31_s30 = ssub.s32 %s1432_s23, %s1934_s26  ;;  %s36_s7 = sadd.s32 1, %s1416_s19 }
   0xc   : > { %s33_s6 = sor.u32 %s32_s28, %s31_s30  ;;  %p1213_p8 = scmp.ge.s32.totalorder %s1436_s24, 8 }
   0xd   : > { %p34_p7 = scmp.eq.s32.totalorder %s33_s6, 0 }
   0xe   : > { %193 = sbr.rel (%p1213_p8) target bundleno = 36 (0x24), region = 32 }
   0xf   : > { %s1525_s8 = scalar_select %p34_p7, %s1416_s19, %s36_s7  }
  0x15   : > { %196 = sbr.rel (!%p45_p5) target bundleno = 36 (0x24), region = 36  ;;  %s198_s9 = sand.u32 (%p45_p5), 1, %s1416_s19  }
  0x16   : > { %s1215_s10 = sshll.u32 (%p45_p5), %s1428_s22, 1  ;;  %s1214_s11 = sshll.u32 (%p45_p5), %s198_s9, 7 }
  0x17   : > { %s1216_s12 = sshll.u32 (%p45_p5), %s1432_s23, 6  ;;  %s200_s27 = scalar_lea.vmem (%p45_p5), [#allocation2], %s1214_s11 }
  0x18   : > { %s203_s13 = sadd.s32 (%p45_p5), %s1216_s12, %s1215_s10 }
  0x19   : > { %s1217_s14 = sshll.u32 (%p45_p5), %s203_s13, 3 }
  0x1a   : > { %s1534_s17 = scalar_lea.vmem (%p45_p5), %s1916_s0, %s1217_s14 }
  0x1b   : > { %v218_v0 = vld [vmem:[%s1534_s17] sm:$0xff] (%p45_p5)  ;;  %v220_v1 = vld [vmem:[%s1534_s17 + $0x8] sm:$0xff] (%p45_p5) }
  0x1c   : > { %v222_v2 = vld [vmem:[%s1534_s17 + $0x40] sm:$0xff]  ;;  %219 = vst [vmem:[%s200_s27] sm:$0xff] %v218_v0  ;;  %221 = vst [vmem:[%s200_s27 + $0x8] sm:$0xff] %v220_v1  ;;  %v224_v3 = vld [vmem:[%s1534_s17 + $0x48] sm:$0xff] }
  0x1d   : > { %223 = vst [vmem:[%s200_s27 + $0x10] sm:$0xff] %v222_v2  ;;  %v226_v4 = vld [vmem:[%s1534_s17 + $0x80] sm:$0xff]  ;;  %v228_v5 = vld [vmem:[%s1534_s17 + $0x88] sm:$0xff]  ;;  %225 = vst [vmem:[%s200_s27 + $0x18] sm:$0xff] %v224_v3 }
  0x1e   : > { %227 = vst [vmem:[%s200_s27 + $0x20] sm:$0xff] %v226_v4  ;;  %229 = vst [vmem:[%s200_s27 + $0x28] sm:$0xff] %v228_v5  ;;  %v230_v6 = vld [vmem:[%s1534_s17 + $0xc0] sm:$0xff]  ;;  %v232_v7 = vld [vmem:[%s1534_s17 + $0xc8] sm:$0xff] }
  0x1f   : > { %v234_v8 = vld [vmem:[%s1534_s17 + $0x100] sm:$0xff]  ;;  %231 = vst [vmem:[%s200_s27 + $0x30] sm:$0xff] %v230_v6  ;;  %233 = vst [vmem:[%s200_s27 + $0x38] sm:$0xff] %v232_v7  ;;  %v236_v9 = vld [vmem:[%s1534_s17 + $0x108] sm:$0xff] }
  0x20   : > { %235 = vst [vmem:[%s200_s27 + $0x40] sm:$0xff] %v234_v8  ;;  %v238_v10 = vld [vmem:[%s1534_s17 + $0x140] sm:$0xff]  ;;  %v240_v11 = vld [vmem:[%s1534_s17 + $0x148] sm:$0xff]  ;;  %237 = vst [vmem:[%s200_s27 + $0x48] sm:$0xff] %v236_v9 }
  0x21   : > { %239 = vst [vmem:[%s200_s27 + $0x50] sm:$0xff] %v238_v10  ;;  %241 = vst [vmem:[%s200_s27 + $0x58] sm:$0xff] %v240_v11  ;;  %v242_v12 = vld [vmem:[%s1534_s17 + $0x180] sm:$0xff]  ;;  %v244_v13 = vld [vmem:[%s1534_s17 + $0x188] sm:$0xff] }
  0x22   : > { %v246_v14 = vld [vmem:[%s1534_s17 + $0x1c0] sm:$0xff]  ;;  %243 = vst [vmem:[%s200_s27 + $0x60] sm:$0xff] %v242_v12  ;;  %245 = vst [vmem:[%s200_s27 + $0x68] sm:$0xff] %v244_v13  ;;  %v248_v15 = vld [vmem:[%s1534_s17 + $0x1c8] sm:$0xff] }
  0x23   : > { %247 = vst [vmem:[%s200_s27 + $0x70] sm:$0xff] %v246_v14  ;;  %249 = vst [vmem:[%s200_s27 + $0x78] sm:$0xff] %v248_v15 }
  0x24 PF: > { %p1218_p9 = scmp.ge.s32.totalorder %s1436_s24, 1  ;;  %p254_p10 = scmp.lt.s32.totalorder %s1436_s24, 9 }
  0x26   : > { %p255_p11 = pnand %p1218_p9, %p254_p10 }
  0x27   : > { %s261_s28 = sand.u32 (!%p255_p11), 1, %s1412_s18   ;;  %v1438_v16 = vmov (!%p255_p11), 0   ;;  %v330_v40 = vld [vmem:[%s1918_s2] sm:$0xff] (!%p255_p11)  ;;  %v332_v41 = vld [vmem:[%s1918_s2 + $0x10] sm:$0xff] (!%p255_p11)  ;;  %v331_v43 = vld [vmem:[%s1918_s2 + $0x8] sm:$0xff] (!%p255_p11)  ;;  %vm466_vm0 = vcmask (!%p255_p11), 523264  }
  0x28   : > { %258 = sbr.rel (%p255_p11) target bundleno = 624 (0x270), region = 59  ;;  %s1555_s30 = sshll.u32 (!%p255_p11), %s261_s28, 7  ;;  %523 = vmatprep.mubr.bf16.mxu0 (!%p255_p11), %v1438_v16  ;;  %1304 = vset.pattern.permute.xlu0 (!%p255_p11), %v1438_v16  ;;  %v333_v44 = vld [vmem:[%s1918_s2 + $0x18] sm:$0xff] (!%p255_p11)  ;;  %v1306_v45 = vld [vmem:[%s1917_s1] sm:$0xff] (!%p255_p11)   ;;  %v335_v47 = vld [vmem:[%s1918_s2 + $0x28] sm:$0xff] (!%p255_p11) }
  0x29   : > { %1305 = vset.pattern.permute.xlu1 (!%p255_p11), %v1438_v16  ;;  %1020 = vmatprep.mubr.bf16.mxu1 (!%p255_p11), %v1438_v16  ;;  %s263_s6 = scalar_lea.vmem (!%p255_p11), [#allocation2], %s1555_s30  ;;  %v334_v46 = vld [vmem:[%s1918_s2 + $0x20] sm:$0xff] (!%p255_p11)  ;;  %v336_v48 = vld [vmem:[%s1918_s2 + $0x30] sm:$0xff] (!%p255_p11)  ;;  %v337_v49 = vld [vmem:[%s1918_s2 + $0x38] sm:$0xff] (!%p255_p11)  ;;  %s1854_s9 = scalar_lea.vmem (!%p255_p11), [#allocation3], %s1555_s30 }
  0x2a   : > { %v291_v17 = vld [vmem:[%s263_s6 + $0x8] sm:$0xff] (!%p255_p11)  ;;  %v293_v18 = vld [vmem:[%s263_s6 + $0x18] sm:$0xff] (!%p255_p11)  ;;  %v290_v19 = vld [vmem:[%s263_s6] sm:$0xff] (!%p255_p11)  ;;  %348 = vperm.xlu0 (!%p255_p11), %1304, %v330_v40   ;;  %358 = vperm.xlu1 (!%p255_p11), %1305, %v332_v41  }
  0x2b   : > { %v307_v20 = vpack.c.bf16 (!%p255_p11), %v293_v18, %v291_v17  ;;  %v292_v21 = vld [vmem:[%s263_s6 + $0x10] sm:$0xff] (!%p255_p11)  ;;  %v295_v22 = vld [vmem:[%s263_s6 + $0x28] sm:$0xff] (!%p255_p11)  ;;  %v297_v23 = vld [vmem:[%s263_s6 + $0x38] sm:$0xff] (!%p255_p11) }
  0x2c   : > { %v306_v24 = vpack.c.bf16 (!%p255_p11), %v292_v21, %v290_v19  ;;  %v309_v25 = vpack.c.bf16 (!%p255_p11), %v297_v23, %v295_v22  ;;  %v294_v26 = vld [vmem:[%s263_s6 + $0x20] sm:$0xff] (!%p255_p11)  ;;  %v296_v27 = vld [vmem:[%s263_s6 + $0x30] sm:$0xff] (!%p255_p11)  ;;  %v299_v28 = vld [vmem:[%s263_s6 + $0x48] sm:$0xff] (!%p255_p11) }
  0x2d   : > { %491 = vmatprep.subr.bf16.mxu0 (!%p255_p11), %v307_v20  ;;  %v301_v29 = vld [vmem:[%s263_s6 + $0x58] sm:$0xff] (!%p255_p11)  ;;  %v308_v30 = vpack.c.bf16 (!%p255_p11), %v296_v27, %v294_v26  ;;  %v298_v31 = vld [vmem:[%s263_s6 + $0x40] sm:$0xff] (!%p255_p11)  ;;  %v300_v32 = vld [vmem:[%s263_s6 + $0x50] sm:$0xff] (!%p255_p11) }
  0x2e   : > { %492 = vmatpush1.bf16.msra.mxu0 (!%p255_p11), %v306_v24  ;;  %v311_v33 = vpack.c.bf16 (!%p255_p11), %v301_v29, %v299_v28  ;;  %v303_v34 = vld [vmem:[%s263_s6 + $0x68] sm:$0xff] (!%p255_p11)  ;;  %v305_v35 = vld [vmem:[%s263_s6 + $0x78] sm:$0xff] (!%p255_p11)  ;;  %v310_v36 = vpack.c.bf16 (!%p255_p11), %v300_v32, %v298_v31  ;;  %v302_v37 = vld [vmem:[%s263_s6 + $0x60] sm:$0xff] (!%p255_p11)  ;;  %353 = vperm.xlu0 (!%p255_p11), %1304, %v331_v43  }
  0x2f   : > { %493 = vmatprep.subr.bf16.mxu0 %v309_v25  ;;  %v313_v38 = vpack.c.bf16 %v305_v35, %v303_v34  ;;  %v304_v39 = vld [vmem:[%s263_s6 + $0x70] sm:$0xff]  ;;  %363 = vperm.xlu1 %1305, %v333_v44   ;;  %v1307_v50 = vld [vmem:[%s1917_s1 + $0x8] sm:$0xff]   ;;  %v338_v51 = vld [vmem:[%s1918_s2 + $0x40] sm:$0xff]  ;;  %s1242_s30 = sshll.u32 (%p1517_p6), %s1420_s20, 1  ;;  %s1243_s10 = sshll.u32 (%p1517_p6), %s1424_s21, 6 }
  0x30   : > { %v312_v42 = vpack.c.bf16 %v304_v39, %v302_v37  ;;  %v339_v52 = vld [vmem:[%s1918_s2 + $0x48] sm:$0xff]  ;;  %v340_v53 = vld [vmem:[%s1918_s2 + $0x50] sm:$0xff]  ;;  %v341_v54 = vld [vmem:[%s1918_s2 + $0x58] sm:$0xff]  ;;  %s1086_s29 = sadd.s32 (%p1517_p6), %s1243_s10, %s1242_s30 }
  0x31   : > { %v1308_v55 = vld [vmem:[%s1917_s1 + $0x10] sm:$0xff]   ;;  %v342_v56 = vld [vmem:[%s1918_s2 + $0x60] sm:$0xff]  ;;  %v343_v57 = vld [vmem:[%s1918_s2 + $0x68] sm:$0xff]  ;;  %s1244_s11 = sshll.u32 (%p1517_p6), %s1086_s29, 3 }
  0x32   : > { %494 = vmatpush1.bf16.msra.mxu0 %v308_v30  ;;  %368 = vperm.xlu0 %1304, %v334_v46   ;;  %v344_v58 = vld [vmem:[%s1918_s2 + $0x70] sm:$0xff]  ;;  %v345_v59 = vld [vmem:[%s1918_s2 + $0x78] sm:$0xff]  ;;  %v916_v61 = vld [vmem:[%s1920_s4] sm:$0xff]  ;;  %s1088_s14 = scalar_lea.vmem (%p1517_p6), %s1921_s5, %s1244_s11 }
  0x33   : > { %495 = vmatprep.subr.bf16.mxu0 %v311_v33  ;;  %373 = vperm.xlu1 %1305, %v335_v47   ;;  %v1309_v60 = vld [vmem:[%s1917_s1 + $0x18] sm:$0xff]   ;;  %v917_v62 = vld [vmem:[%s1920_s4 + $0x8] sm:$0xff]  ;;  %v918_v63 = vld [vmem:[%s1920_s4 + $0x10] sm:$0xff] }
  0x34   : > { %v919_v0 = vld [vmem:[%s1920_s4 + $0x18] sm:$0xff]  ;;  %v1310_v1 = vld [vmem:[%s1917_s1 + $0x20] sm:$0xff]   ;;  %v921_v3 = vld [vmem:[%s1920_s4 + $0x28] sm:$0xff] }
  0x35   : > { %v920_v2 = vld [vmem:[%s1920_s4 + $0x20] sm:$0xff]  ;;  %v922_v4 = vld [vmem:[%s1920_s4 + $0x30] sm:$0xff]  ;;  %v923_v5 = vld [vmem:[%s1920_s4 + $0x38] sm:$0xff] }
  0x36   : > { %496 = vmatpush1.bf16.msra.mxu0 %v310_v36  ;;  %378 = vperm.xlu0 %1304, %v336_v48   ;;  %v1311_v6 = vld [vmem:[%s1917_s1 + $0x28] sm:$0xff]   ;;  %v1312_v7 = vld [vmem:[%s1917_s1 + $0x30] sm:$0xff]   ;;  %v1313_v8 = vld [vmem:[%s1917_s1 + $0x38] sm:$0xff]  }
  0x37   : > { %497 = vmatprep.subr.bf16.mxu0 %v313_v38  ;;  %383 = vperm.xlu1 %1305, %v337_v49  }
  0x3a   : > { %498 = vmatpush1.bf16.msra.mxu0 %v312_v42  ;;  %388 = vperm.xlu0 %1304, %v338_v51  }
  0x3b   : > { %393 = vperm.xlu1 %1305, %v339_v52  }
  0x3d   : > { %1229 = vmatmul.mubr.msk.bf16.vlgmr.msra.gmra.mrb[0].mxu0 %vm466_vm0, %v1306_v45 }
  0x3e   : > { %533 = vmatprep.mubr.bf16.mxu0 %v1438_v16  ;;  %398 = vperm.xlu0 %1304, %v340_v53  }
  0x3f   : > { %403 = vperm.xlu1 %1305, %v341_v54  }
  0x42   : > { %408 = vperm.xlu0 %1304, %v342_v56  }
  0x43   : > { %413 = vperm.xlu1 %1305, %v343_v57  }
  0x45   : > { %1230 = vmatmul.mubr.msk.bf16.gmra.mrb[4].mxu0 %vm466_vm0, %v1307_v50 }
  0x46   : > { %543 = vmatprep.mubr.bf16.mxu0 %v1438_v16  ;;  %418 = vperm.xlu0 %1304, %v344_v58  }
  0x47   : > { %423 = vperm.xlu1 %1305, %v345_v59  }
  0x4a   : > { %926 = vperm.xlu0 %1304, %v916_v61  }
  0x4b   : > { %931 = vperm.xlu1 %1305, %v917_v62  }
  0x4d   : > { %1231 = vmatmul.mubr.msk.bf16.gmra.mrb[8].mxu0 %vm466_vm0, %v1308_v55 }
  0x4e   : > { %553 = vmatprep.mubr.bf16.mxu0 %v1438_v16  ;;  %936 = vperm.xlu0 %1304, %v918_v63  }
  0x4f   : > { %941 = vperm.xlu1 %1305, %v919_v0  }
  0x52   : > { %946 = vperm.xlu0 %1304, %v920_v2  }
  0x53   : > { %951 = vperm.xlu1 %1305, %v921_v3  }
  0x55   : > { %1232 = vmatmul.mubr.msk.bf16.gmra.mrb[12].mxu0 %vm466_vm0, %v1309_v60 }
  0x56   : > { %563 = vmatprep.mubr.bf16.mxu0 %v1438_v16  ;;  %956 = vperm.xlu0 %1304, %v922_v4  }
  0x57   : > { %961 = vperm.xlu1 %1305, %v923_v5  }
  0x5d   : > { %1233 = vmatmul.mubr.msk.bf16.gmra.mrb[16].mxu0 %vm466_vm0, %v1310_v1 }
  0x5e   : > { %573 = vmatprep.mubr.bf16.mxu0 %v1438_v16 }
  0x65   : > { %1234 = vmatmul.mubr.msk.bf16.gmra.mrb[20].mxu0 %vm466_vm0, %v1311_v6 }
  0x66   : > { %583 = vmatprep.mubr.bf16.mxu0 %v1438_v16 }
  0x6d   : > { %1235 = vmatmul.mubr.msk.bf16.gmra.mrb[24].mxu0 %vm466_vm0, %v1312_v7 }
  0x6e   : > { %593 = vmatprep.mubr.bf16.mxu0 %v1438_v16 }
  0x75   : > { %1236 = vmatmul.mubr.msk.bf16.gmra.mrb[28].mxu0 %vm466_vm0, %v1313_v8 }
  0xa9   : > { %v349_v9 = vpop.permute.xlu0 %348  ;;  %v359_v24 = vpop.permute.xlu1 %358 }
  0xad   : > { %v354_v13 = vpop.permute.xlu0 %353 }
  0xae   : > { %v364_v44 = vpop.permute.xlu1 %363 }
  0xb1   : > { %v369_v60 = vpop.permute.xlu0 %368 }
 0x110   : > { %v525_v10 = vpop.f32.mrb[0].mxu0 }
 0x111   : > { %v526_v11 = vadd.f32 %v525_v10, %v349_v9  ;;  %v527_v12 = vpop.f32.mrb[1].mxu0 }
 0x112   : > { %v528_v14 = vadd.f32 %v527_v12, %v349_v9  ;;  %v529_v15 = vpop.f32.mrb[2].mxu0 }
 0x113   : > { %v636_v17 = vmul.f32 %v526_v11, %v526_v11  ;;  %v530_v18 = vadd.f32 %v529_v15, %v354_v13  ;;  %v531_v19 = vpop.f32.mrb[3].mxu0  ;;  %v604_v29 = vmul.f32 0.7978846, %v526_v11  ;;  %v1673_v36 = vmul.f32 0.5, %v526_v11  ;;  %v374_v15 = vpop.permute.xlu1 %373 }
 0x114   : > { %v637_v20 = vmul.f32 %v528_v14, %v528_v14  ;;  %v532_v21 = vadd.f32 %v531_v19, %v354_v13  ;;  %v605_v39 = vmul.f32 0.7978846, %v528_v14  ;;  %v1677_v48 = vmul.f32 0.5, %v528_v14 }
 0x115   : > { %v668_v22 = vmul.f32 0.044715, %v636_v17  ;;  %v638_v23 = vmul.f32 %v530_v18, %v530_v18  ;;  %v606_v41 = vmul.f32 0.7978846, %v530_v18  ;;  %v1675_v45 = vmul.f32 0.5, %v530_v18 }
 0x116   : > { %v639_v25 = vmul.f32 %v532_v21, %v532_v21  ;;  %v669_v27 = vmul.f32 0.044715, %v637_v20  ;;  %v607_v50 = vmul.f32 0.7978846, %v532_v21  ;;  %v1679_v55 = vmul.f32 0.5, %v532_v21 }
 0x117   : > { %v700_v26 = vadd.f32 1.0, %v668_v22  ;;  %v670_v28 = vmul.f32 0.044715, %v638_v23 }
 0x118   : > { %v671_v30 = vmul.f32 0.044715, %v639_v25  ;;  %v535_v31 = vpop.f32.mrb[4].mxu0  ;;  %v701_v40 = vadd.f32 1.0, %v669_v27 }
 0x119   : > { %v702_v32 = vadd.f32 1.0, %v670_v28  ;;  %v536_v33 = vadd.f32 %v535_v31, %v359_v24  ;;  %v537_v34 = vpop.f32.mrb[5].mxu0  ;;  %v732_v35 = vmul.f32 %v700_v26, %v604_v29 }
 0x11a   : > { %v538_v37 = vadd.f32 %v537_v34, %v359_v24  ;;  %v539_v38 = vpop.f32.mrb[6].mxu0  ;;  %v703_v46 = vadd.f32 1.0, %v671_v30  ;;  %v733_v56 = vmul.f32 %v701_v40, %v605_v39 }
 0x11b   : > { %v640_v42 = vmul.f32 %v536_v33, %v536_v33  ;;  %v541_v43 = vpop.f32.mrb[7].mxu0  ;;  %v734_v49 = vmul.f32 %v702_v32, %v606_v41  ;;  %v540_v52 = vadd.f32 %v539_v38, %v364_v44  ;;  %1318 = vtanh.f32 %v732_v35 }
 0x11c   : > { %v641_v47 = vmul.f32 %v538_v37, %v538_v37  ;;  %v542_v54 = vadd.f32 %v541_v43, %v364_v44  ;;  %v608_v57 = vmul.f32 0.7978846, %v536_v33  ;;  %v735_v61 = vmul.f32 %v703_v46, %v607_v50 }
 0x11d   : > { %v672_v51 = vmul.f32 0.044715, %v640_v42  ;;  %v642_v59 = vmul.f32 %v540_v52, %v540_v52  ;;  %v1681_v62 = vmul.f32 0.5, %v536_v33  ;;  %1320 = vtanh.f32 %v734_v49  ;;  %v384_v42 = vpop.permute.xlu1 %383 }
 0x11e   : > { %v673_v53 = vmul.f32 0.044715, %v641_v47  ;;  %v643_v0 = vmul.f32 %v542_v54, %v542_v54  ;;  %v609_v2 = vmul.f32 0.7978846, %v538_v37  ;;  %v1683_v7 = vmul.f32 0.5, %v538_v37  ;;  %v379_v37 = vpop.permute.xlu0 %378 }
 0x11f   : > { %v704_v58 = vadd.f32 1.0, %v672_v51  ;;  %v674_v3 = vmul.f32 0.044715, %v642_v59  ;;  %v610_v11 = vmul.f32 0.7978846, %v540_v52  ;;  %1322 = vtanh.f32 %v733_v56 }
 0x120   : > { %v705_v63 = vadd.f32 1.0, %v673_v53  ;;  %v545_v1 = vpop.f32.mrb[8].mxu0  ;;  %v675_v8 = vmul.f32 0.044715, %v643_v0  ;;  %v1685_v18 = vmul.f32 0.5, %v540_v52  ;;  %1324 = vtanh.f32 %v735_v61 }
 0x121   : > { %v546_v4 = vadd.f32 %v545_v1, %v369_v60  ;;  %v547_v5 = vpop.f32.mrb[9].mxu0  ;;  %v736_v6 = vmul.f32 %v704_v58, %v608_v57  ;;  %v706_v12 = vadd.f32 1.0, %v674_v3  ;;  %v611_v21 = vmul.f32 0.7978846, %v542_v54 }
 0x122   : > { %v548_v9 = vadd.f32 %v547_v5, %v369_v60  ;;  %v549_v10 = vpop.f32.mrb[10].mxu0  ;;  %v737_v17 = vmul.f32 %v705_v63, %v609_v2  ;;  %v707_v19 = vadd.f32 1.0, %v675_v8  ;;  %v1687_v24 = vmul.f32 0.5, %v542_v54 }
 0x123   : > { %v644_v13 = vmul.f32 %v546_v4, %v546_v4  ;;  %v551_v14 = vpop.f32.mrb[11].mxu0  ;;  %v738_v20 = vmul.f32 %v706_v12, %v610_v11  ;;  %1326 = vtanh.f32 %v736_v6  ;;  %v550_v25 = vadd.f32 %v549_v10, %v374_v15 }
 0x124   : > { %v645_v23 = vmul.f32 %v548_v9, %v548_v9  ;;  %v552_v26 = vadd.f32 %v551_v14, %v374_v15  ;;  %v739_v27 = vmul.f32 %v707_v19, %v611_v21  ;;  %v612_v28 = vmul.f32 0.7978846, %v546_v4 }
 0x125   : > { %v676_v22 = vmul.f32 0.044715, %v644_v13  ;;  %v1319_v31 = vpop.eup %1318  ;;  %1328 = vtanh.f32 %v737_v17  ;;  %v1689_v32 = vmul.f32 0.5, %v546_v4  ;;  %v613_v33 = vmul.f32 0.7978846, %v548_v9 }
 0x126   : > { %v677_v30 = vmul.f32 0.044715, %v645_v23  ;;  %v646_v34 = vmul.f32 %v550_v25, %v550_v25  ;;  %1330 = vtanh.f32 %v738_v20  ;;  %v1691_v39 = vmul.f32 0.5, %v548_v9 }
 0x127   : > { %v708_v29 = vadd.f32 1.0, %v676_v22  ;;  %v647_v40 = vmul.f32 %v552_v26, %v552_v26  ;;  %v1321_v50 = vpop.eup %1320  ;;  %1332 = vtanh.f32 %v739_v27  ;;  %v828_v54 = vadd.f32 1.0, %v1319_v31  ;;  %v389_v31 = vpop.permute.xlu0 %388 }
 0x128   : > { %v555_v35 = vpop.f32.mrb[12].mxu0  ;;  %v709_v38 = vadd.f32 1.0, %v677_v30  ;;  %v678_v44 = vmul.f32 0.044715, %v646_v34  ;;  %v614_v57 = vmul.f32 0.7978846, %v550_v25 }
 0x129   : > { %v557_v41 = vpop.f32.mrb[13].mxu0  ;;  %v740_v43 = vmul.f32 %v708_v29, %v612_v28  ;;  %v556_v46 = vadd.f32 %v555_v35, %v379_v37  ;;  %v679_v51 = vmul.f32 0.044715, %v647_v40  ;;  %v1323_v60 = vpop.eup %1322  ;;  %v1693_v61 = vmul.f32 0.5, %v550_v25 }
 0x12a   : > { %v558_v47 = vadd.f32 %v557_v41, %v379_v37  ;;  %v559_v49 = vpop.f32.mrb[14].mxu0  ;;  %v741_v56 = vmul.f32 %v709_v38, %v613_v33  ;;  %v710_v58 = vadd.f32 1.0, %v678_v44  ;;  %v615_v63 = vmul.f32 0.7978846, %v552_v26  ;;  %v1325_v2 = vpop.eup %1324 }
 0x12b   : > { %v560_v52 = vadd.f32 %v559_v49, %v384_v42  ;;  %v561_v53 = vpop.f32.mrb[15].mxu0  ;;  %v648_v59 = vmul.f32 %v556_v46, %v556_v46  ;;  %v711_v0 = vadd.f32 1.0, %v679_v51  ;;  %1334 = vtanh.f32 %v740_v43  ;;  %v394_v49 = vpop.permute.xlu1 %393 }
 0x12c   : > { %v649_v1 = vmul.f32 %v558_v47, %v558_v47  ;;  %v1695_v3 = vmul.f32 0.5, %v552_v26  ;;  %v616_v4 = vmul.f32 0.7978846, %v556_v46  ;;  %v742_v6 = vmul.f32 %v710_v58, %v614_v57 }
 0x12d   : > { %v680_v5 = vmul.f32 0.044715, %v648_v59  ;;  %v1697_v8 = vmul.f32 0.5, %v556_v46  ;;  %v650_v10 = vmul.f32 %v560_v52, %v560_v52  ;;  %v1699_v11 = vpop.eup %1326  ;;  %1336 = vtanh.f32 %v741_v56 }
 0x12e   : > { %v681_v9 = vmul.f32 0.044715, %v649_v1  ;;  %v562_v13 = vadd.f32 %v561_v53, %v384_v42  ;;  %v829_v14 = vadd.f32 1.0, %v1323_v60  ;;  %v743_v17 = vmul.f32 %v711_v0, %v615_v63 }
 0x12f   : > { %v712_v12 = vadd.f32 1.0, %v680_v5  ;;  %v682_v20 = vmul.f32 0.044715, %v650_v10  ;;  %v831_v21 = vadd.f32 1.0, %v1325_v2  ;;  %v1329_v23 = vpop.eup %1328  ;;  %v617_v25 = vmul.f32 0.7978846, %v558_v47 }
 0x130   : > { %v565_v15 = vpop.f32.mrb[16].mxu0  ;;  %v713_v19 = vadd.f32 1.0, %v681_v9  ;;  %v1701_v26 = vmul.f32 0.5, %v558_v47  ;;  %v618_v27 = vmul.f32 0.7978846, %v560_v52  ;;  %v651_v28 = vmul.f32 %v562_v13, %v562_v13  ;;  %v1703_v30 = vpop.eup %1330 }
 0x131   : > { %v567_v22 = vpop.f32.mrb[17].mxu0  ;;  %1338 = vtanh.f32 %v742_v6  ;;  %v714_v33 = vadd.f32 1.0, %v682_v20  ;;  %v861_v34 = vmul.f32 %v829_v14, %v1677_v48  ;;  %v863_v35 = vmul.f32 %v831_v21, %v1679_v55  ;;  %v1333_v43 = vpop.eup %1332 }
 0x132   : > { %v569_v29 = vpop.f32.mrb[18].mxu0  ;;  %v744_v38 = vmul.f32 %v712_v12, %v616_v4  ;;  %v683_v40 = vmul.f32 0.044715, %v651_v28  ;;  %v566_v41 = vadd.f32 %v565_v15, %v389_v31  ;;  %v830_v42 = vadd.f32 1.0, %v1321_v50 }
 0x133   : > { %v571_v37 = vpop.f32.mrb[19].mxu0  ;;  %1340 = vtanh.f32 %v743_v17  ;;  %v745_v44 = vmul.f32 %v713_v19, %v617_v25  ;;  %v1707_v46 = vmul.f32 0.5, %v560_v52  ;;  %v901_v47 = vpack.c.bf16 %v863_v35, %v861_v34  ;;  %v399_v17 = vpop.permute.xlu0 %398 }
 0x134   : > { %v746_v51 = vmul.f32 %v714_v33, %v618_v27  ;;  %v619_v53 = vmul.f32 0.7978846, %v562_v13  ;;  %v652_v56 = vmul.f32 %v566_v41, %v566_v41  ;;  %v860_v57 = vmul.f32 %v828_v54, %v1673_v36 }
 0x135   : > { %v715_v48 = vadd.f32 1.0, %v683_v40  ;;  %988 = vmatprep.subr.bf16.mxu1 %v901_v47  ;;  %v862_v55 = vmul.f32 %v830_v42, %v1675_v45  ;;  %v568_v58 = vadd.f32 %v567_v22, %v389_v31  ;;  %v570_v59 = vadd.f32 %v569_v29, %v394_v49  ;;  %v1711_v60 = vpop.eup %1334 }
 0x136   : > { %1342 = vtanh.f32 %v744_v38  ;;  %v1713_v50 = vmul.f32 0.5, %v562_v13  ;;  %v684_v52 = vmul.f32 0.044715, %v652_v56  ;;  %v1715_v63 = vadd.f32 %v571_v37, %v394_v49 }
 0x137   : > { %1344 = vtanh.f32 %v745_v44  ;;  %v620_v1 = vmul.f32 0.7978846, %v566_v41  ;;  %v900_v2 = vpack.c.bf16 %v862_v55, %v860_v57  ;;  %v653_v4 = vmul.f32 %v568_v58, %v568_v58  ;;  %v1337_v54 = vpop.eup %1336 }
 0x138   : > { %v575_v0 = vpop.f32.mrb[20].mxu0  ;;  %1346 = vtanh.f32 %v746_v51  ;;  %v1717_v5 = vmul.f32 0.5, %v566_v41  ;;  %v654_v45 = vmul.f32 %v570_v59, %v570_v59  ;;  %v833_v6 = vadd.f32 1.0, %v1329_v23  ;;  %v404_v51 = vpop.permute.xlu1 %403 }
 0x139   : > { %v577_v36 = vpop.f32.mrb[21].mxu0  ;;  %v747_v10 = vmul.f32 %v715_v48, %v619_v53  ;;  %v716_v12 = vadd.f32 1.0, %v684_v52  ;;  %989 = vmatpush1.bf16.msra.mxu1 %v900_v2  ;;  %v685_v13 = vmul.f32 0.044715, %v653_v4  ;;  %v655_v14 = vmul.f32 %v1715_v63, %v1715_v63 }
 0x13a   : > { %v579_v9 = vpop.f32.mrb[22].mxu0  ;;  %v621_v19 = vmul.f32 0.7978846, %v568_v58  ;;  %v1721_v20 = vmul.f32 0.5, %v568_v58  ;;  %v686_v21 = vmul.f32 0.044715, %v654_v45  ;;  %v576_v29 = vadd.f32 %v575_v0, %v399_v17 }
 0x13b   : > { %v581_v15 = vpop.f32.mrb[23].mxu0  ;;  %v835_v22 = vadd.f32 1.0, %v1333_v43  ;;  %v1723_v25 = vpop.eup %1338  ;;  %v717_v27 = vadd.f32 1.0, %v685_v13  ;;  %v622_v28 = vmul.f32 0.7978846, %v570_v59  ;;  %v865_v33 = vmul.f32 %v833_v6, %v1683_v7 }
 0x13c   : > { %v687_v23 = vmul.f32 0.044715, %v655_v14  ;;  %v718_v31 = vadd.f32 1.0, %v686_v21  ;;  %v832_v35 = vadd.f32 1.0, %v1699_v11  ;;  %v748_v38 = vmul.f32 %v716_v12, %v620_v1  ;;  %v409_v14 = vpop.permute.xlu0 %408 }
 0x13d   : > { %v867_v34 = vmul.f32 %v835_v22, %v1687_v24  ;;  %v1341_v37 = vpop.eup %1340  ;;  %v623_v40 = vmul.f32 0.7978846, %v1715_v63  ;;  %v656_v42 = vmul.f32 %v576_v29, %v576_v29  ;;  %1348 = vtanh.f32 %v747_v10 }
 0x13e   : > { %v719_v41 = vadd.f32 1.0, %v687_v23  ;;  %v749_v43 = vmul.f32 %v717_v27, %v621_v19  ;;  %v834_v47 = vadd.f32 1.0, %v1703_v30  ;;  %v750_v53 = vmul.f32 %v718_v31, %v622_v28 }
 0x13f   : > { %v903_v44 = vpack.c.bf16 %v867_v34, %v865_v33  ;;  %v1730_v56 = vmul.f32 0.5, %v570_v59  ;;  %v688_v24 = vmul.f32 0.044715, %v656_v42  ;;  %v864_v48 = vmul.f32 %v832_v35, %v1681_v62 }
 0x140   : > { %v585_v49 = vpop.f32.mrb[24].mxu0  ;;  %v751_v7 = vmul.f32 %v719_v41, %v623_v40  ;;  %v1732_v11 = vpop.eup %1342  ;;  %v866_v55 = vmul.f32 %v834_v47, %v1685_v18  ;;  %v578_v58 = vadd.f32 %v577_v36, %v399_v17  ;;  %v580_v52 = vadd.f32 %v579_v9, %v404_v51 }
 0x141   : > { %v587_v57 = vpop.f32.mrb[25].mxu0  ;;  %990 = vmatprep.subr.bf16.mxu1 %v903_v44  ;;  %v1736_v1 = vpop.eup %1344  ;;  %1350 = vtanh.f32 %v748_v38  ;;  %v720_v30 = vadd.f32 1.0, %v688_v24  ;;  %v1738_v2 = vadd.f32 %v581_v15, %v404_v51  ;;  %v837_v59 = vadd.f32 1.0, %v1337_v54 }
 0x142   : > { %v589_v0 = vpop.f32.mrb[26].mxu0  ;;  %v1740_v45 = vpop.eup %1346  ;;  %1352 = vtanh.f32 %v749_v43  ;;  %v1743_v6 = vmul.f32 0.5, %v1715_v63  ;;  %v902_v62 = vpack.c.bf16 %v866_v55, %v864_v48  ;;  %v657_v10 = vmul.f32 %v578_v58, %v578_v58 }
 0x143   : > { %v591_v4 = vpop.f32.mrb[27].mxu0  ;;  %1354 = vtanh.f32 %v750_v53  ;;  %v624_v18 = vmul.f32 0.7978846, %v576_v29  ;;  %v1745_v36 = vmul.f32 0.5, %v576_v29  ;;  %v658_v9 = vmul.f32 %v580_v52, %v580_v52  ;;  %v414_v24 = vpop.permute.xlu1 %413 }
 0x144   : > { %1356 = vtanh.f32 %v751_v7  ;;  %991 = vmatpush1.bf16.msra.mxu1 %v902_v62  ;;  %v625_v12 = vmul.f32 0.7978846, %v578_v58  ;;  %v689_v13 = vmul.f32 0.044715, %v657_v10  ;;  %v659_v54 = vmul.f32 %v1738_v2, %v1738_v2 }
 0x145   : > { %v752_v15 = vmul.f32 %v720_v30, %v624_v18  ;;  %v690_v17 = vmul.f32 0.044715, %v658_v9  ;;  %v839_v19 = vadd.f32 1.0, %v1341_v37  ;;  %v869_v63 = vmul.f32 %v837_v59, %v1691_v39 }
 0x146   : > { %v721_v21 = vadd.f32 1.0, %v689_v13  ;;  %v691_v22 = vmul.f32 0.044715, %v659_v54  ;;  %v1750_v27 = vadd.f32 %v585_v49, %v409_v14  ;;  %v836_v28 = vadd.f32 1.0, %v1711_v60 }
 0x147   : > { %v722_v29 = vadd.f32 1.0, %v690_v17  ;;  %v871_v31 = vmul.f32 %v839_v19, %v1695_v3  ;;  %v838_v33 = vadd.f32 1.0, %v1723_v25  ;;  %v1755_v34 = vadd.f32 %v587_v57, %v409_v14  ;;  %v1349_v38 = vpop.eup %1348 }
 0x148   : > { %v595_v23 = vpop.f32.mrb[28].mxu0  ;;  %v753_v40 = vmul.f32 %v721_v21, %v625_v12  ;;  %v626_v37 = vmul.f32 0.7978846, %v580_v52  ;;  %v723_v41 = vadd.f32 1.0, %v691_v22  ;;  %v660_v39 = vmul.f32 %v1750_v27, %v1750_v27 }
 0x149   : > { %v597_v35 = vpop.f32.mrb[29].mxu0  ;;  %v1761_v43 = vmul.f32 0.5, %v578_v58  ;;  %v1763_v60 = vmul.f32 0.5, %v580_v52  ;;  %v627_v3 = vmul.f32 0.7978846, %v1738_v2  ;;  %v905_v44 = vpack.c.bf16 %v871_v31, %v869_v63 }
 0x14a   : > { %v1759_v42 = vpop.f32.mrb[30].mxu0  ;;  %v754_v47 = vmul.f32 %v722_v29, %v626_v37  ;;  %v692_v49 = vmul.f32 0.044715, %v660_v39  ;;  %v868_v51 = vmul.f32 %v836_v28, %v1689_v32  ;;  %v870_v53 = vmul.f32 %v838_v33, %v1693_v61 }
 0x14b   : > { %v1766_v25 = vpop.f32.mrb[31].mxu0  ;;  %v1770_v7 = vpop.eup %1350  ;;  %1358 = vtanh.f32 %v752_v15  ;;  %v755_v57 = vmul.f32 %v723_v41, %v627_v3  ;;  %992 = vmatprep.subr.bf16.mxu1 %v905_v44  ;;  %v628_v48 = vmul.f32 0.7978846, %v1750_v27  ;;  %v661_v55 = vmul.f32 %v1755_v34, %v1755_v34 }
 0x14c   : > { %v1353_v58 = vpop.eup %1352  ;;  %1360 = vtanh.f32 %v753_v40  ;;  %v724_v52 = vadd.f32 1.0, %v692_v49  ;;  %v904_v30 = vpack.c.bf16 %v870_v53, %v868_v51  ;;  %v1775_v59 = vadd.f32 %v589_v0, %v414_v24  ;;  %v419_v15 = vpop.permute.xlu0 %418 }
 0x14d   : > { %v1777_v32 = vpop.eup %1354  ;;  %v693_v61 = vmul.f32 0.044715, %v661_v55  ;;  %v1779_v62 = vadd.f32 %v591_v4, %v414_v24  ;;  %v841_v10 = vadd.f32 1.0, %v1736_v1  ;;  %v843_v18 = vadd.f32 1.0, %v1349_v38  ;;  %v424_v3 = vpop.permute.xlu1 %423 }
 0x14e   : > { %v1357_v9 = vpop.eup %1356  ;;  %1362 = vtanh.f32 %v754_v47  ;;  %v756_v12 = vmul.f32 %v724_v52, %v628_v48  ;;  %993 = vmatpush1.bf16.msra.mxu1 %v904_v30  ;;  %v629_v13 = vmul.f32 0.7978846, %v1755_v34  ;;  %v662_v54 = vmul.f32 %v1775_v59, %v1775_v59 }
 0x14f   : > { %1364 = vtanh.f32 %v755_v57  ;;  %v725_v0 = vadd.f32 1.0, %v693_v61  ;;  %v630_v14 = vmul.f32 0.7978846, %v1775_v59  ;;  %v663_v4 = vmul.f32 %v1779_v62, %v1779_v62 }
 0x150   : > { %1366 = vtanh.f32 %v756_v12  ;;  %v694_v1 = vmul.f32 0.044715, %v662_v54  ;;  %v873_v17 = vmul.f32 %v841_v10, %v1701_v26  ;;  %v875_v19 = vmul.f32 %v843_v18, %v1713_v50 }
 0x151   : > { %v757_v63 = vmul.f32 %v725_v0, %v629_v13  ;;  %v695_v21 = vmul.f32 0.044715, %v663_v4  ;;  %v1790_v22 = vadd.f32 %v595_v23, %v419_v15  ;;  %v840_v28 = vadd.f32 1.0, %v1732_v11 }
 0x152   : > { %v726_v29 = vadd.f32 1.0, %v694_v1  ;;  %v907_v31 = vpack.c.bf16 %v875_v19, %v873_v17  ;;  %v842_v33 = vadd.f32 1.0, %v1740_v45  ;;  %v1794_v38 = vadd.f32 %v597_v35, %v419_v15 }
 0x153   : > { %1368 = vtanh.f32 %v757_v63  ;;  %v631_v40 = vmul.f32 0.7978846, %v1779_v62  ;;  %v727_v37 = vadd.f32 1.0, %v695_v21  ;;  %v664_v26 = vmul.f32 %v1790_v22, %v1790_v22 }
 0x154   : > { %v787_v50 = vmul.f32 0.5, %v1738_v2  ;;  %v758_v41 = vmul.f32 %v726_v29, %v630_v14  ;;  %994 = vmatprep.subr.bf16.mxu1 %v907_v31  ;;  %v872_v23 = vmul.f32 %v840_v28, %v1697_v8  ;;  %v874_v11 = vmul.f32 %v842_v33, %v1707_v46 }
 0x155   : > { %v1359_v39 = vpop.eup %1358  ;;  %v1803_v45 = vmul.f32 0.5, %v1750_v27  ;;  %v759_v35 = vmul.f32 %v727_v37, %v631_v40  ;;  %v696_v44 = vmul.f32 0.044715, %v664_v26  ;;  %v665_v47 = vmul.f32 %v1794_v38, %v1794_v38 }
 0x156   : > { %v1361_v49 = vpop.eup %1360  ;;  %1370 = vtanh.f32 %v758_v41  ;;  %v632_v2 = vmul.f32 0.7978846, %v1790_v22  ;;  %v906_v51 = vpack.c.bf16 %v874_v11, %v872_v23  ;;  %v1809_v53 = vadd.f32 %v1759_v42, %v424_v3 }
 0x157   : > { %1372 = vtanh.f32 %v759_v35  ;;  %v728_v8 = vadd.f32 1.0, %v696_v44  ;;  %v697_v46 = vmul.f32 0.044715, %v665_v47  ;;  %v1812_v24 = vadd.f32 %v1766_v25, %v424_v3 }
 0x158   : > { %v1363_v27 = vpop.eup %1362  ;;  %v789_v57 = vmul.f32 0.5, %v1755_v34  ;;  %995 = vmatpush1.bf16.msra.mxu1 %v906_v51  ;;  %v633_v48 = vmul.f32 0.7978846, %v1794_v38  ;;  %v666_v55 = vmul.f32 %v1809_v53, %v1809_v53  ;;  %v845_v52 = vadd.f32 1.0, %v1353_v58 }
 0x159   : > { %v1365_v30 = vpop.eup %1364  ;;  %v760_v61 = vmul.f32 %v728_v8, %v632_v2  ;;  %v729_v42 = vadd.f32 1.0, %v697_v46  ;;  %v634_v10 = vmul.f32 0.7978846, %v1809_v53  ;;  %v667_v18 = vmul.f32 %v1812_v24, %v1812_v24 }
 0x15a   : > { %v1367_v25 = vpop.eup %1366  ;;  %v698_v12 = vmul.f32 0.044715, %v666_v55  ;;  %v635_v13 = vmul.f32 0.7978846, %v1812_v24  ;;  %v847_v34 = vadd.f32 1.0, %v1357_v9  ;;  %v877_v54 = vmul.f32 %v845_v52, %v1721_v20 }
 0x15b   : > { %1374 = vtanh.f32 %v760_v61  ;;  %v761_v0 = vmul.f32 %v729_v42, %v633_v48  ;;  %v699_v14 = vmul.f32 0.044715, %v667_v18  ;;  %v844_v58 = vadd.f32 1.0, %v1770_v7 }
 0x15c   : > { %v730_v4 = vadd.f32 1.0, %v698_v12  ;;  %v879_v15 = vmul.f32 %v847_v34, %v1743_v6  ;;  %v846_v1 = vadd.f32 1.0, %v1777_v32  ;;  %v849_v17 = vadd.f32 1.0, %v1361_v49 }
 0x15d   : > { %v1369_v19 = vpop.eup %1368  ;;  %1376 = vtanh.f32 %v761_v0  ;;  %v731_v63 = vadd.f32 1.0, %v699_v14  ;;  %v876_v21 = vmul.f32 %v844_v58, %v1717_v5  ;;  %v851_v28 = vadd.f32 1.0, %v1365_v30  ;;  %v932_v14 = vpop.permute.xlu1 %931 }
 0x15e   : > { %v762_v9 = vmul.f32 %v730_v4, %v634_v10  ;;  %v909_v29 = vpack.c.bf16 %v879_v15, %v877_v54  ;;  %v878_v20 = vmul.f32 %v846_v1, %v1730_v56  ;;  %v881_v31 = vmul.f32 %v849_v17, %v1761_v43 }
 0x15f   : > { %v763_v33 = vmul.f32 %v731_v63, %v635_v13  ;;  %v883_v7 = vmul.f32 %v851_v28, %v787_v50  ;;  %v848_v40 = vadd.f32 1.0, %v1359_v39  ;;  %v850_v37 = vadd.f32 1.0, %v1363_v27  ;;  %v1314_v13 = vld [vmem:[%s1919_s3] sm:$0xff]  }
 0x160   : > { %v1371_v6 = vpop.eup %1370  ;;  %1378 = vtanh.f32 %v762_v9  ;;  %996 = vmatprep.subr.bf16.mxu1 %v909_v29  ;;  %v908_v32 = vpack.c.bf16 %v878_v20, %v876_v21  ;;  %v853_v26 = vadd.f32 1.0, %v1369_v19  ;;  %v852_v41 = vadd.f32 1.0, %v1367_v25 }
 0x161   : > { %v1373_v23 = vpop.eup %1372  ;;  %1380 = vtanh.f32 %v763_v33  ;;  %v911_v5 = vpack.c.bf16 %v883_v7, %v881_v31  ;;  %v880_v11 = vmul.f32 %v848_v40, %v1745_v36  ;;  %v882_v3 = vmul.f32 %v850_v37, %v1763_v60  ;;  %v942_v28 = vpop.permute.xlu1 %941 }
 0x162   : > { %v790_v56 = vmul.f32 0.5, %v1775_v59  ;;  %v791_v43 = vmul.f32 0.5, %v1779_v62  ;;  %997 = vmatpush1.bf16.msra.mxu1 %v908_v32  ;;  %v855_v50 = vadd.f32 1.0, %v1373_v23  ;;  %v854_v39 = vadd.f32 1.0, %v1371_v6 }
 0x163   : > { %998 = vmatprep.subr.bf16.mxu1 %v911_v5  ;;  %v910_v35 = vpack.c.bf16 %v882_v3, %v880_v11  ;;  %v885_v44 = vmul.f32 %v853_v26, %v789_v57  ;;  %v884_v49 = vmul.f32 %v852_v41, %v1803_v45  ;;  %v792_v48 = vmul.f32 0.5, %v1790_v22  ;;  %v1315_v22 = vld [vmem:[%s1919_s3 + $0x8] sm:$0xff]  }
 0x164   : > { %v887_v47 = vmul.f32 %v855_v50, %v791_v43  ;;  %v886_v2 = vmul.f32 %v854_v39, %v790_v56  ;;  %v794_v55 = vmul.f32 0.5, %v1809_v53  ;;  %v793_v52 = vmul.f32 0.5, %v1794_v38  ;;  %v1316_v38 = vld [vmem:[%s1919_s3 + $0x10] sm:$0xff]   ;;  %v1317_v53 = vld [vmem:[%s1919_s3 + $0x18] sm:$0xff]  }
 0x165   : > { %v1375_v51 = vpop.eup %1374  ;;  %v795_v45 = vmul.f32 0.5, %v1812_v24  ;;  %v927_v24 = vpop.permute.xlu0 %926 }
 0x166   : > { %999 = vmatpush1.bf16.msra.mxu1 %v910_v35  ;;  %v913_v8 = vpack.c.bf16 %v887_v47, %v885_v44  ;;  %v912_v36 = vpack.c.bf16 %v886_v2, %v884_v49  ;;  %v856_v60 = vadd.f32 1.0, %v1375_v51  ;;  %v952_v32 = vpop.permute.xlu1 %951 }
 0x167   : > { %v1377_v46 = vpop.eup %1376 }
 0x168   : > { %1000 = vmatprep.subr.bf16.mxu1 %v913_v8  ;;  %v857_v62 = vadd.f32 1.0, %v1377_v46  ;;  %v888_v61 = vmul.f32 %v856_v60, %v792_v48 }
 0x169   : > { %v937_v17 = vpop.permute.xlu0 %936 }
 0x16a   : > { %v1379_v59 = vpop.eup %1378  ;;  %1001 = vmatpush1.bf16.msra.mxu1 %v912_v36  ;;  %v889_v10 = vmul.f32 %v857_v62, %v793_v52  ;;  %v962_v39 = vpop.permute.xlu1 %961 }
 0x16b   : > { %v1381_v27 = vpop.eup %1380  ;;  %v858_v57 = vadd.f32 1.0, %v1379_v59 }
 0x16c   : > { %v859_v30 = vadd.f32 1.0, %v1381_v27 }
 0x16d   : > { %v890_v42 = vmul.f32 %v858_v57, %v794_v55  ;;  %v947_v7 = vpop.permute.xlu0 %946 }
 0x16e   : > { %v891_v18 = vmul.f32 %v859_v30, %v795_v45 }
 0x16f   : > { %v914_v25 = vpack.c.bf16 %v890_v42, %v888_v61 }
 0x170   : > { %v915_v12 = vpack.c.bf16 %v891_v18, %v889_v10 }
 0x171   : > { %v957_v3 = vpop.permute.xlu0 %956 }
 0x172   : > { %1002 = vmatprep.subr.bf16.mxu1 %v915_v12 }
 0x173   : > { %1003 = vmatpush1.bf16.msra.mxu1 %v914_v25 }
 0x176   : > { %1021 = vmatmul.mubr.bf16.vlgmr.msra.gmra.mrb[0].mxu1 %v1314_v13 }
 0x177   : > { %1030 = vmatprep.mubr.bf16.mxu1 %v1438_v16 }
 0x17e   : > { %1031 = vmatmul.mubr.bf16.gmra.mrb[4].mxu1 %v1315_v22 }
 0x17f   : > { %1040 = vmatprep.mubr.bf16.mxu1 %v1438_v16 }
 0x186   : > { %1041 = vmatmul.mubr.bf16.gmra.mrb[8].mxu1 %v1316_v38 }
 0x187   : > { %1050 = vmatprep.mubr.bf16.mxu1 %v1438_v16 }
 0x18e   : > { %1051 = vmatmul.mubr.bf16.gmra.mrb[12].mxu1 %v1317_v53 }
 0x249   : > { %v1022_v34 = vpop.f32.mrb[0].mxu1 }
 0x24a   : > { %v1023_v54 = vadd.f32 %v1022_v34, %v927_v24  ;;  %v1024_v0 = vpop.f32.mrb[1].mxu1 }
 0x24b   : > { %v1025_v58 = vadd.f32 %v1024_v0, %v927_v24  ;;  %v1026_v4 = vpop.f32.mrb[2].mxu1 }
 0x24c   : > { %1061 = vst [vmem:[%s1854_s9] sm:$0xff] %v1023_v54  ;;  %v1027_v16 = vadd.f32 %v1026_v4, %v932_v14  ;;  %v1028_v15 = vpop.f32.mrb[3].mxu1 }
 0x24d   : > { %1062 = vst [vmem:[%s1854_s9 + $0x8] sm:$0xff] %v1025_v58  ;;  %v1029_v1 = vadd.f32 %v1028_v15, %v932_v14 }
 0x24e   : > { %1063 = vst [vmem:[%s1854_s9 + $0x10] sm:$0xff] %v1027_v16 }
 0x24f   : > { %1064 = vst [vmem:[%s1854_s9 + $0x18] sm:$0xff] %v1029_v1 }
 0x251   : > { %v1032_v19 = vpop.f32.mrb[4].mxu1 }
 0x252   : > { %v1033_v63 = vadd.f32 %v1032_v19, %v937_v17  ;;  %v1034_v21 = vpop.f32.mrb[5].mxu1 }
 0x253   : > { %v1035_v9 = vadd.f32 %v1034_v21, %v937_v17  ;;  %v1036_v29 = vpop.f32.mrb[6].mxu1  ;;  %v1101_v51 = vld [vmem:[%s1854_s9] sm:$0xff] (%p1517_p6) }
 0x254   : > { %1065 = vst [vmem:[%s1854_s9 + $0x20] sm:$0xff] %v1033_v63  ;;  %v1037_v20 = vadd.f32 %v1036_v29, %v942_v28  ;;  %v1038_v31 = vpop.f32.mrb[7].mxu1  ;;  %v1103_v8 = vld [vmem:[%s1854_s9 + $0x8] sm:$0xff] (%p1517_p6)  ;;  %1102 = vst [vmem:[%s1088_s14] sm:$0xff] (%p1517_p6), %v1101_v51 }
 0x255   : > { %1066 = vst [vmem:[%s1854_s9 + $0x28] sm:$0xff] %v1035_v9  ;;  %v1039_v33 = vadd.f32 %v1038_v31, %v942_v28  ;;  %v1105_v36 = vld [vmem:[%s1854_s9 + $0x10] sm:$0xff] (%p1517_p6)  ;;  %1104 = vst [vmem:[%s1088_s14 + $0x8] sm:$0xff] (%p1517_p6), %v1103_v8 }
 0x256   : > { %1067 = vst [vmem:[%s1854_s9 + $0x30] sm:$0xff] %v1037_v20  ;;  %v1107_v46 = vld [vmem:[%s1854_s9 + $0x18] sm:$0xff] (%p1517_p6)  ;;  %1106 = vst [vmem:[%s1088_s14 + $0x40] sm:$0xff] (%p1517_p6), %v1105_v36 }
 0x257   : > { %1068 = vst [vmem:[%s1854_s9 + $0x38] sm:$0xff] %v1039_v33  ;;  %1108 = vst [vmem:[%s1088_s14 + $0x48] sm:$0xff] (%p1517_p6), %v1107_v46 }
 0x259   : > { %v1042_v40 = vpop.f32.mrb[8].mxu1 }
 0x25a   : > { %v1043_v37 = vadd.f32 %v1042_v40, %v947_v7  ;;  %v1044_v6 = vpop.f32.mrb[9].mxu1 }
 0x25b   : > { %v1045_v26 = vadd.f32 %v1044_v6, %v947_v7  ;;  %v1046_v41 = vpop.f32.mrb[10].mxu1  ;;  %v1109_v60 = vld [vmem:[%s1854_s9 + $0x20] sm:$0xff] (%p1517_p6) }
 0x25c   : > { %1069 = vst [vmem:[%s1854_s9 + $0x40] sm:$0xff] %v1043_v37  ;;  %v1047_v23 = vadd.f32 %v1046_v41, %v952_v32  ;;  %v1048_v5 = vpop.f32.mrb[11].mxu1  ;;  %v1111_v59 = vld [vmem:[%s1854_s9 + $0x28] sm:$0xff] (%p1517_p6)  ;;  %1110 = vst [vmem:[%s1088_s14 + $0x80] sm:$0xff] (%p1517_p6), %v1109_v60 }
 0x25d   : > { %1070 = vst [vmem:[%s1854_s9 + $0x48] sm:$0xff] %v1045_v26  ;;  %v1049_v11 = vadd.f32 %v1048_v5, %v952_v32  ;;  %v1113_v62 = vld [vmem:[%s1854_s9 + $0x30] sm:$0xff] (%p1517_p6)  ;;  %1112 = vst [vmem:[%s1088_s14 + $0x88] sm:$0xff] (%p1517_p6), %v1111_v59 }
 0x25e   : > { %1071 = vst [vmem:[%s1854_s9 + $0x50] sm:$0xff] %v1047_v23  ;;  %v1115_v27 = vld [vmem:[%s1854_s9 + $0x38] sm:$0xff] (%p1517_p6)  ;;  %1114 = vst [vmem:[%s1088_s14 + $0xc0] sm:$0xff] (%p1517_p6), %v1113_v62 }
 0x25f   : > { %1072 = vst [vmem:[%s1854_s9 + $0x58] sm:$0xff] %v1049_v11  ;;  %1116 = vst [vmem:[%s1088_s14 + $0xc8] sm:$0xff] (%p1517_p6), %v1115_v27 }
 0x261   : > { %v1052_v56 = vpop.f32.mrb[12].mxu1  ;;  %1083 = sbr.rel (!%p1517_p6) target bundleno = 624 (0x270), region = 67 }
 0x262   : > { %v1053_v43 = vadd.f32 %v1052_v56, %v957_v3  ;;  %v1054_v50 = vpop.f32.mrb[13].mxu1 }
 0x263   : > { %v1055_v35 = vadd.f32 %v1054_v50, %v957_v3  ;;  %v1056_v44 = vpop.f32.mrb[14].mxu1  ;;  %v1117_v48 = vld [vmem:[%s1854_s9 + $0x40] sm:$0xff] (%p1517_p6) }
 0x264   : > { %1073 = vst [vmem:[%s1854_s9 + $0x60] sm:$0xff] %v1053_v43  ;;  %v1057_v47 = vadd.f32 %v1056_v44, %v962_v39  ;;  %v1058_v49 = vpop.f32.mrb[15].mxu1  ;;  %v1119_v55 = vld [vmem:[%s1854_s9 + $0x48] sm:$0xff] (%p1517_p6)  ;;  %1118 = vst [vmem:[%s1088_s14 + $0x100] sm:$0xff] (%p1517_p6), %v1117_v48 }
 0x265   : > { %1074 = vst [vmem:[%s1854_s9 + $0x68] sm:$0xff] %v1055_v35  ;;  %v1059_v2 = vadd.f32 %v1058_v49, %v962_v39  ;;  %v1121_v57 = vld [vmem:[%s1854_s9 + $0x50] sm:$0xff] (%p1517_p6)  ;;  %1120 = vst [vmem:[%s1088_s14 + $0x108] sm:$0xff] (%p1517_p6), %v1119_v55 }
 0x266   : > { %1075 = vst [vmem:[%s1854_s9 + $0x70] sm:$0xff] %v1057_v47  ;;  %v1123_v52 = vld [vmem:[%s1854_s9 + $0x58] sm:$0xff] (%p1517_p6)  ;;  %1122 = vst [vmem:[%s1088_s14 + $0x140] sm:$0xff] (%p1517_p6), %v1121_v57 }
 0x267   : > { %1076 = vst [vmem:[%s1854_s9 + $0x78] sm:$0xff] %v1059_v2  ;;  %1124 = vst [vmem:[%s1088_s14 + $0x148] sm:$0xff] (%p1517_p6), %v1123_v52 }
 0x26b   : > { %v1125_v45 = vld [vmem:[%s1854_s9 + $0x60] sm:$0xff] }
 0x26c   : > { %v1127_v30 = vld [vmem:[%s1854_s9 + $0x68] sm:$0xff]  ;;  %1126 = vst [vmem:[%s1088_s14 + $0x180] sm:$0xff] %v1125_v45 }
 0x26d   : > { %v1129_v61 = vld [vmem:[%s1854_s9 + $0x70] sm:$0xff]  ;;  %1128 = vst [vmem:[%s1088_s14 + $0x188] sm:$0xff] %v1127_v30 }
 0x26e   : > { %1130 = vst [vmem:[%s1088_s14 + $0x1c0] sm:$0xff] %v1129_v61  ;;  %v1131_v42 = vld [vmem:[%s1854_s9 + $0x78] sm:$0xff] }
 0x26f   : > { %1132 = vst [vmem:[%s1088_s14 + $0x1c8] sm:$0xff] %v1131_v42 }
 0x270 PF: > { %s15_s24 = sadd.s32 1, %s1436_s24   ;;  %s1923_s18 = smov %s1416_s19 }
 0x271   : > { %p12_p12 = scmp.ge.s32.totalorder %s15_s24, 10   ;;  %s1924_s19 = smov %s1525_s8 }
 0x272   : > { %s1925_s20 = smov %s1428_s22  ;;  %s1926_s21 = smov %s1432_s23 }
 0x273   : > { %s1927_s22 = smov %s1930_s25  ;;  %s1928_s23 = smov %s1934_s26 }
 0x274   :  { %14 = sbr.rel (!%p12_p12) target bundleno = 4 (0x4), region = 121 }

</bundles_post_ra>
